<compile_context>
chip_gen: v7x
topology: tpu7x:2x2x1
jax: 0.10.0
libtpu: 0.0.40
codegen_flags: <defaults>
</compile_context>

<pallas_src>
import functools
import math

import jax
import jax.numpy as jnp
from jax import lax
from jax.experimental import pallas as pl
from jax.experimental.pallas import tpu as pltpu


def _selective_sigmoid_kernel(x_ref, o_ref, *, start, end, period, compute_dtype):
    """Lanes whose (col % period) lies in [start, end) -> (1 + tanh(x)) / 2."""
    x = x_ref[...]
    L = x.shape[-1]
    # Mask is identical for every row: compute it on a (1, L) strip only and
    # let jnp.where broadcast it across the sublane (row) dimension.
    col = lax.broadcasted_iota(jnp.int32, (1, L), 1)
    pos = col % period if period != L else col   # L % period == 0 by construction
    sel = (pos >= start) & (pos < end)
    y = ((1.0 + jnp.tanh(x.astype(compute_dtype))) * 0.5).astype(x.dtype)
    o_ref[...] = jnp.where(sel, y, x)


def _round_down8(n):
    return (n // 8) * 8


def _chip_config():
    """Generation-specific tuning knobs (safe defaults if detection fails)."""
    kind = ""
    try:
        kind = jax.devices()[0].device_kind.lower()
    except Exception:  # pragma: no cover - detection is best-effort only
        pass
    if "v7" in kind:   # 2 TCs/chip, 64 MiB VMEM per TC, ~3.2 TB/s HBM
        return dict(block_bytes=8 << 20, vmem_limit=48 << 20, min_steps=4,
                    bf16_native=True)
    if "v6" in kind:   # 128 MiB VMEM, ~1.4 TB/s HBM
        return dict(block_bytes=8 << 20, vmem_limit=64 << 20, min_steps=2,
                    bf16_native=True)
    if "v5" in kind:   # no bf16 VPU/EUP, 16 MiB scoped-VMEM default
        return dict(block_bytes=4 << 20, vmem_limit=32 << 20, min_steps=2,
                    bf16_native=False)
    return dict(block_bytes=4 << 20, vmem_limit=32 << 20, min_steps=2,
                bf16_native=False)


def selective_sigmoid(x, start, end, *, target_lanes=2048):
    """Applies SelectiveSigmoid along the last axis of x (any leading shape)."""
    orig_shape = x.shape
    if len(orig_shape) == 0:
        raise ValueError("selective_sigmoid needs at least 1 dimension")
    D = orig_shape[-1]
    N = math.prod(orig_shape)
    if N == 0:
        return x

    # Normalize start / end with Python slice semantics for the last axis.
    s = 0 if start is None else int(start)
    e = D if end is None else int(end)
    if s < 0:
        s += D
    if e < 0:
        e += D
    s = min(max(s, 0), D)
    e = min(max(e, 0), D)
    if s >= e:          # empty slice -> the module is a no-op
        return x

    cfg = _chip_config()
    itemsize = jnp.dtype(x.dtype).itemsize
    # bf16 tanh runs natively on v6e/v7x (tiny divergence vs an f32-accumulated
    # reference is acceptable); v5e / unknown chips compute in f32.
    compute_dtype = (jnp.bfloat16
                     if (x.dtype == jnp.bfloat16 and cfg["bf16_native"])
                     else jnp.float32)

    # ---- Choose a 2-D (R, L) view of the tensor.  Never pad. ----
    base = (D * 128) // math.gcd(D, 128)          # lcm(D, 128)
    lane_dense = (N % base == 0) and (8 * base * itemsize * 4 <= cfg["vmem_limit"])
    if lane_dense:
        # Largest L = base * mult (<= ~target_lanes) that divides N exactly.
        mult = max(1, min(target_lanes // base, N // base))
        while N % (base * mult) != 0:
            mult -= 1
        L = base * mult
    else:
        # Exact (rows, D) view: last block dim == full array dim, legal for any
        # D; stores may be lane-masked when D % 128 != 0 (fallback only).
        L = D
    R = N // L
    x2 = x.reshape(R, L)

    # ---- Row tile: big blocks, but enough grid steps for both v7x cores. ----
    if R <= 8:
        tm = R                                    # block == full array dims
    else:
        tm = max(8, _round_down8(cfg["block_bytes"] // (L * itemsize)))
        tm = min(tm, _round_down8(R))
        if R >= cfg["min_steps"] * 8:
            tm = min(tm, max(8, _round_down8(R // cfg["min_steps"])))
    grid_r = pl.cdiv(R, tm)

    block_bytes = tm * L * itemsize
    vmem_limit = max(cfg["vmem_limit"], 4 * block_bytes + (2 << 20))

    kernel = functools.partial(
        _selective_sigmoid_kernel,
        start=s, end=e, period=D, compute_dtype=compute_dtype)

    cost = pl.CostEstimate(
        flops=3 * N,
        transcendentals=N,                 # tanh evaluated on every streamed elem
        bytes_accessed=2 * N * itemsize)   # one read + one write pass over HBM

    out = pl.pallas_call(
        kernel,
        out_shape=jax.ShapeDtypeStruct((R, L), x.dtype),
        grid_spec=pltpu.PrefetchScalarGridSpec(
            num_scalar_prefetch=0,
            grid=(grid_r,),
            in_specs=[pl.BlockSpec((tm, L), lambda i: (i, 0))],
            out_specs=pl.BlockSpec((tm, L), lambda i: (i, 0)),
        ),
        input_output_aliases={0: 0},       # op is in-place in the PyTorch module
        compiler_params=pltpu.CompilerParams(
            dimension_semantics=("parallel",),
            vmem_limit_bytes=int(vmem_limit),
        ),
        cost_estimate=cost,
    )(x2)

    return out.reshape(orig_shape)


if __name__ == "__main__":
    key = jax.random.PRNGKey(0)
    # NCHW-like input consistent with typical usage: batch=2, channels=4, 16x16.
    x = jax.random.normal(key, (2, 4, 16, 16), dtype=jnp.float32)
    start, end = 4, 12  # SelectiveSigmoid(start=4, end=12)

    y = selective_sigmoid(x, start, end)
    y = jax.block_until_ready(y)

    # Pure-JAX reference (same semantics as the PyTorch module's forward).
    ref = x.at[..., start:end].set((1.0 + jnp.tanh(x[..., start:end])) / 2.0)
    assert jnp.allclose(y, ref, atol=1e-6, rtol=1e-6), "mismatch vs reference"

    print("KERNEL_OK")
</pallas_src>

<mosaic_0001>
module attributes {stable_mosaic.version = 11 : i64} {
  func.func @_selective_sigmoid_kernel(%arg0: i32, %arg1: memref<1x2048xf32, #tpu.memory_space<vmem>>, %arg2: memref<1x2048xf32, #tpu.memory_space<vmem>>) attributes {dimension_semantics = [#tpu.dimension_semantics<parallel>], iteration_bounds = array<i64: 1>, scalar_prefetch = 0 : i64, scratch_operands = 0 : i64, tpu.core_type = #tpu.core_type<tc>, window_params = [{transform_indices = @transform_0, window_bounds = array<i64: 1, 2048>}, {transform_indices = @transform_1, window_bounds = array<i64: 1, 2048>}]} {
    %c0 = arith.constant 0 : index
    %c0_0 = arith.constant 0 : index
    %0 = vector.load %arg1[%c0, %c0_0] : memref<1x2048xf32, #tpu.memory_space<vmem>>, vector<1x2048xf32>
    %1 = tpu.iota {dimensions = array<i32: 1>} : vector<1x2048xi32>
    %c16_i32 = arith.constant 16 : i32
    %c0_i32 = arith.constant 0 : i32
    %2 = arith.cmpi eq, %c16_i32, %c0_i32 : i32
    %c1_i32 = arith.constant 1 : i32
    %3 = arith.select %2, %c1_i32, %c16_i32 : i32
    %4 = vector.broadcast %3 : i32 to vector<1x2048xi32>
    %5 = arith.remsi %1, %4 : vector<1x2048xi32>
    %c0_i32_1 = arith.constant 0 : i32
    %6 = vector.broadcast %c0_i32_1 : i32 to vector<1x2048xi32>
    %7 = arith.cmpi ne, %5, %6 : vector<1x2048xi32>
    %c0_i32_2 = arith.constant 0 : i32
    %8 = vector.broadcast %c0_i32_2 : i32 to vector<1x2048xi32>
    %9 = arith.cmpi slt, %5, %8 : vector<1x2048xi32>
    %c0_i32_3 = arith.constant 0 : i32
    %10 = arith.cmpi slt, %3, %c0_i32_3 : i32
    %11 = vector.broadcast %10 : i1 to vector<1x2048xi1>
    %12 = vector.broadcast %11 : vector<1x2048xi1> to vector<1x2048xi1>
    %13 = arith.xori %9, %12 : vector<1x2048xi1>
    %14 = arith.andi %13, %7 : vector<1x2048xi1>
    %15 = vector.broadcast %3 : i32 to vector<1x2048xi32>
    %16 = arith.addi %5, %15 : vector<1x2048xi32>
    %17 = arith.select %14, %16, %5 : vector<1x2048xi1>, vector<1x2048xi32>
    %c4_i32 = arith.constant 4 : i32
    %18 = vector.broadcast %c4_i32 : i32 to vector<1x2048xi32>
    %19 = arith.cmpi sge, %17, %18 : vector<1x2048xi32>
    %c12_i32 = arith.constant 12 : i32
    %20 = vector.broadcast %c12_i32 : i32 to vector<1x2048xi32>
    %21 = arith.cmpi slt, %17, %20 : vector<1x2048xi32>
    %22 = arith.andi %19, %21 : vector<1x2048xi1>
    %23 = math.tanh %0 : vector<1x2048xf32>
    %cst = arith.constant 1.000000e+00 : f32
    %24 = vector.broadcast %cst : f32 to vector<1x2048xf32>
    %25 = arith.addf %24, %23 : vector<1x2048xf32>
    %cst_4 = arith.constant 5.000000e-01 : f32
    %26 = vector.broadcast %cst_4 : f32 to vector<1x2048xf32>
    %27 = arith.mulf %25, %26 : vector<1x2048xf32>
    %28 = arith.select %22, %27, %0 : vector<1x2048xi1>, vector<1x2048xf32>
    %c0_5 = arith.constant 0 : index
    %c0_6 = arith.constant 0 : index
    %29 = vector.load %arg2[%c0_5, %c0_6] : memref<1x2048xf32, #tpu.memory_space<vmem>>, vector<1x2048xf32>
    tpu.vector_store %arg2[%c0_5, %c0_6], %28 {strides = array<i32>} : memref<1x2048xf32, #tpu.memory_space<vmem>>, vector<1x2048xf32>,
    return
  }
  func.func @transform_0(%arg0: i32) -> (i32, i32) {
    %c0_i32 = arith.constant 0 : i32
    %c0_i32_0 = arith.constant 0 : i32
    return %arg0, %c0_i32 : i32, i32
  }
  func.func @transform_1(%arg0: i32) -> (i32, i32) {
    %c0_i32 = arith.constant 0 : i32
    %c0_i32_0 = arith.constant 0 : i32
    return %arg0, %c0_i32 : i32, i32
  }
}

</mosaic_0001>

<bundles_post_ra>
// kernel: tpu_custom_call.1
= control target key start
LH: loop header
LB: loop body
LE: loop exit
PB: predicated region body
PF: predicated region fallthrough
CT: control target
= control target key end

     0   :  { %6 = vsyncpa [#allocation3], 0  ;;  %s1059_s0 = inlined_call_operand.hbm [shape: f32[1,2048], index: 0, kind: input, shape index: {}, may-alias: {0,1}]   ;;  %s1060_s1 = inlined_call_operand.hbm [shape: f32[1,2048], index: 1, kind: output, shape index: {}, may-alias: {0,1}]  }
   0x1   :  { %7 = vsyncpa [#allocation4], 0  ;;  %s654_s6 = smov [#allocation2]   ;;  %s606_s10 = scalar_lea.hbm %s1059_s0, 256 }
   0x2   :  { %s14_s7 = sshll.u32 %s654_s6, 4  ;;  %p607_p0 = scmp.ne.s32.totalorder %s1059_s0, %s606_s10  ;;  %s15_s7 = int_to_ptr.vmem [resolvable:$true] %s14_s7 }
   0x3   :  { %p610_p1 = scmp.lt.u32.totalorder %s606_s10, %s1059_s0 }
   0x5   :  { %p612_p2 = pnand %p610_p1, %p607_p0 }
   0x7   :  { %615 = shalt.err (!%p612_p2)
}
   0x8   :  { %s616_s15 = scalar_lea.vmem %s15_s7, 256  ;;  %p621_p4 = scmp.lt.s32.totalorder %s15_s7, %s15_s7 }
   0x9   :  { %p617_p3 = scmp.ne.s32.totalorder %s15_s7, %s616_s15  ;;  %p622_p5 = scmp.lt.s32.totalorder %s616_s15, %s616_s15 }
   0xb   :  { %p623_p6 = por %p622_p5, %p621_p4 }
   0xd   :  { %p624_p7 = pnand %p623_p6, %p617_p3 }
   0xf   :  { %627 = shalt.err (!%p624_p7)
}
  0x10   :  { %17 = dma.hbm_to_vmem [thread:$0]  %s1059_s0, 256, %s15_s7, [#allocation3]  }
  0x11   :  { %650 = dma.done.wait [#allocation3], 256  }
  0x12   :  { %651 = vsyncadd [#allocation3], 4294967040  ;;  %v23_v0 = vlaneseq  ;;  %v679_v9 = vld [vmem:[#allocation2] sm:$0xff]  ;;  %v655_v12 = vmov 1966171168   ;;  %v1083_v26 = vmov 0 }
  0x13   :  { %v487_v13 = vunpack.c.l.s4 %v655_v12  ;;  %602 = vtanh.f32 %v679_v9  ;;  %v1085_v27 = vmov 0  ;;  %v1099_v36 = vmov 0  ;;  %v794_v61 = vld [vmem:[#allocation2 + $0x8] sm:$0xff]  ;;  %s656_s0 = smov [#allocation5]  }
  0x14   :  { %v24_v1 = vand.u32 127, %v23_v0  ;;  %v289_v19 = vshrl.u32 %v23_v0, 7  ;;  %v1101_v37 = vmov 0  ;;  %v1103_v38 = vmov 0  ;;  %s590_s18 = sshll.u32 %s656_s0, 4  ;;  %s591_s18 = int_to_ptr.vmem [resolvable:$true] %s590_s18 }
  0x15   :  { %v488_v23 = vunpack.c.0.s8 %v487_v13  ;;  %v1105_v39 = vmov 0  ;;  %604 = vtanh.f32 %v794_v61  ;;  %v1109_v12 = vmov 0  ;;  %s628_s19 = scalar_lea.vmem %s591_s18, 256  ;;  %p633_p9 = scmp.lt.s32.totalorder %s591_s18, %s591_s18 }
  0x16   :  { %v25_v2 = vadd.s32 128, %v24_v1  ;;  %v26_v3 = vadd.s32 256, %v24_v1  ;;  %v27_v4 = vadd.s32 384, %v24_v1  ;;  %v28_v5 = vadd.s32 512, %v24_v1  ;;  %p629_p8 = scmp.ne.s32.totalorder %s591_s18, %s628_s19  ;;  %p634_p10 = scmp.lt.s32.totalorder %s628_s19, %s628_s19 }
  0x17   :  { %v29_v6 = vadd.s32 640, %v24_v1  ;;  %v30_v7 = vadd.s32 768, %v24_v1  ;;  %v31_v8 = vadd.s32 896, %v24_v1  ;;  %v44_v10 = vand.u32 15, %v24_v1 }
  0x18   :  { %v51_v11 = vand.u32 15, %v25_v2  ;;  %v58_v14 = vand.u32 15, %v26_v3  ;;  %v65_v15 = vand.u32 15, %v27_v4  ;;  %v72_v16 = vand.u32 15, %v28_v5  ;;  %p635_p11 = por %p634_p10, %p633_p9 }
  0x19   :  { %v79_v17 = vand.u32 15, %v29_v6  ;;  %v86_v18 = vand.u32 15, %v30_v7  ;;  %v93_v20 = vand.u32 15, %v31_v8  ;;  %vm682_vm0 = vcmp.ge.s32.totalorder %v44_v10, 4 }
  0x1a   :  { %vm686_vm1 = vcmp.ge.s32.totalorder %v51_v11, 4  ;;  %vm690_vm2 = vcmp.ge.s32.totalorder %v58_v14, 4  ;;  %vm694_vm3 = vcmp.ge.s32.totalorder %v65_v15, 4  ;;  %vm698_vm4 = vcmp.ge.s32.totalorder %v72_v16, 4  ;;  %p636_p12 = pnand %p635_p11, %p629_p8 }
  0x1b   :  { %v1084_v26 = vsel %vm698_vm4, 4294967295, %v1083_v26  ;;  %vm702_vm5 = vcmp.ge.s32.totalorder %v79_v17, 4  ;;  %vm706_vm6 = vcmp.ge.s32.totalorder %v86_v18, 4  ;;  %vm710_vm7 = vcmp.lt.s32.totalorder %v44_v10, 12 }
  0x1c   :  { %v1086_v27 = vsel %vm702_vm5, 4294967295, %v1085_v27  ;;  %vm714_vm8 = vcmp.lt.s32.totalorder %v51_v11, 12  ;;  %v718_v31 = vsub.s32 0, %v289_v19  ;;  %v720_v32 = vsub.s32 1, %v289_v19 }
  0x1d   :  { %vm722_vm9 = vcmp.ge.s32.totalorder %v93_v20, 4  ;;  %vm726_vm10 = vcmp.lt.s32.totalorder %v58_v14, 12  ;;  %vm730_vm11 = vcmp.lt.s32.totalorder %v65_v15, 12  ;;  %vm734_vm12 = vcmp.lt.s32.totalorder %v72_v16, 12  ;;  %v603_v58 = vpop.eup %602 }
  0x1e   :  { %v1100_v36 = vsel %vm734_vm12, 4294967295, %v1099_v36  ;;  %vm738_vm13 = vcmp.lt.s32.totalorder %v79_v17, 12  ;;  %vm742_vm14 = vcmp.lt.s32.totalorder %v86_v18, 12  ;;  %vm746_vm15 = vcmp.lt.s32.totalorder %v93_v20, 12 }
  0x1f   :  { %v1102_v37 = vsel %vm738_vm13, 4294967295, %v1101_v37  ;;  %v1104_v38 = vsel %vm742_vm14, 4294967295, %v1103_v38  ;;  %v1106_v39 = vsel %vm746_vm15, 4294967295, %v1105_v39  ;;  %v750_v40 = vsub.s32 2, %v289_v19  ;;  %vm1116_vm14 = vmand %vm682_vm0, %vm710_vm7 }
  0x20   :  { %v752_v41 = vsub.s32 3, %v289_v19  ;;  %v754_v42 = vsub.s32 4, %v289_v19  ;;  %v756_v43 = vsub.s32 5, %v289_v19  ;;  %v32_v44 = vadd.s32 1024, %v24_v1 }
  0x21   :  { %v33_v45 = vadd.s32 1152, %v24_v1  ;;  %v758_v46 = vsub.s32 6, %v289_v19  ;;  %v760_v47 = vsub.s32 7, %v289_v19  ;;  %v373_v48 = vrot.slane %v679_v9, %v718_v31 }
  0x22   :  { %v377_v49 = vrot.slane %v679_v9, %v720_v32  ;;  %v34_v50 = vadd.s32 1280, %v24_v1  ;;  %v35_v51 = vadd.s32 1408, %v24_v1  ;;  %v770_v52 = vadd.s32 1536, %v24_v1 }
  0x23   :  { %v772_v53 = vadd.s32 1664, %v24_v1  ;;  %v381_v54 = vrot.slane %v679_v9, %v750_v40  ;;  %v385_v55 = vrot.slane %v679_v9, %v752_v41  ;;  %v782_v56 = vadd.s32 1792, %v24_v1 }
  0x24   :  { %v784_v57 = vadd.s32 1920, %v24_v1  ;;  %v389_v59 = vrot.slane %v679_v9, %v754_v42  ;;  %v393_v60 = vrot.slane %v679_v9, %v756_v43  ;;  %v100_v62 = vand.u32 15, %v32_v44 }
  0x25   :  { %v107_v63 = vand.u32 15, %v33_v45  ;;  %v282_v0 = vadd.f32 1.0, %v603_v58  ;;  %v397_v1 = vrot.slane %v679_v9, %v758_v46  ;;  %v401_v2 = vrot.slane %v679_v9, %v760_v47 }
  0x26   :  { %v804_v3 = vsub.s32 %v488_v23, %v289_v19  ;;  %v114_v4 = vand.u32 15, %v34_v50  ;;  %v121_v5 = vand.u32 15, %v35_v51  ;;  %v128_v6 = vand.u32 15, %v770_v52 }
  0x27   :  { %v135_v7 = vand.u32 15, %v772_v53  ;;  %v284_v8 = vmul.f32 0.5, %v282_v0  ;;  %v142_v9 = vand.u32 15, %v782_v56  ;;  %v149_v10 = vand.u32 15, %v784_v57 }
  0x28   :  { %vm823_vm12 = vcmp.ge.s32.totalorder %v100_v62, 4  ;;  %v1107_v11 = vmov 0  ;;  %vm827_vm4 = vcmp.ge.s32.totalorder %v107_v63, 4  ;;  %vm831_vm15 = vcmp.lt.s32.totalorder %v100_v62, 12 }
  0x29   :  { %v1108_v11 = vsel %vm823_vm12, 4294967295, %v1107_v11  ;;  %v1110_v12 = vsel %vm827_vm4, 4294967295, %v1109_v12  ;;  %vm835_vm13 = vcmp.lt.s32.totalorder %v107_v63, 12  ;;  %v1113_v14 = vmov 0  ;;  %vm1117_vm4 = vmand %vm686_vm1, %vm714_vm8 }
  0x2a   :  { %v1114_v14 = vsel %vm835_vm13, 4294967295, %v1113_v14  ;;  %vm1115_vm5 = vnez %v1106_v39  ;;  %v291_v15 = vrot.slane %v284_v8, %v718_v31  ;;  %v295_v16 = vrot.slane %v284_v8, %v720_v32  ;;  %vm1118_vm13 = vmand %vm690_vm2, %vm726_vm10 }
  0x2b   :  { %v299_v17 = vrot.slane %v284_v8, %v750_v40  ;;  %v303_v18 = vrot.slane %v284_v8, %v752_v41  ;;  %v307_v19 = vrot.slane %v284_v8, %v754_v42  ;;  %v311_v20 = vrot.slane %v284_v8, %v756_v43  ;;  %vm1119_vm12 = vmand %vm694_vm3, %vm730_vm11 }
  0x2c   :  { %v315_v23 = vrot.slane %v284_v8, %v758_v46  ;;  %v319_v44 = vrot.slane %v284_v8, %v760_v47  ;;  %v450_v45 = vsel %vm1116_vm14, %v291_v15, %v373_v48  ;;  %v451_v50 = vsel %vm1117_vm4, %v295_v16, %v377_v49  ;;  %vm1128_vm3 = vmand %vm722_vm9, %vm1115_vm5 }
  0x2d   :  { %v452_v51 = vsel %vm1118_vm13, %v299_v17, %v381_v54  ;;  %v453_v21 = vsel %vm1119_vm12, %v303_v18, %v385_v55  ;;  %vm1120_vm0 = vnez %v1084_v26  ;;  %vm1121_vm7 = vnez %v1100_v36  ;;  %v605_v54 = vpop.eup %604 }
  0x2e   :  { %vm1122_vm14 = vmand %vm1120_vm0, %vm1121_vm7  ;;  %vm1123_vm1 = vnez %v1086_v27  ;;  %vm1124_vm4 = vnez %v1102_v37  ;;  %vm1126_vm2 = vnez %v1104_v38  ;;  %v457_v26 = vsel %vm1128_vm3, %v319_v44, %v401_v2 }
  0x2f   :  { %v454_v22 = vsel %vm1122_vm14, %v307_v19, %v389_v59  ;;  %vm1125_vm8 = vmand %vm1123_vm1, %vm1124_vm4  ;;  %v482_v29 = vcombine.low %v450_v45, %v451_v50  ;;  %v483_v30 = vcombine.low %v452_v51, %v453_v21  ;;  %vm891_vm11 = vcmp.ge.s32.totalorder %v114_v4, 4 }
  0x30   :  { %v455_v24 = vsel %vm1125_vm8, %v311_v20, %v393_v60  ;;  %vm1127_vm10 = vmand %vm706_vm6, %vm1126_vm2  ;;  %vm895_vm12 = vcmp.ge.s32.totalorder %v121_v5, 4  ;;  %vm899_vm6 = vcmp.lt.s32.totalorder %v114_v4, 12  ;;  %vm903_vm13 = vcmp.lt.s32.totalorder %v121_v5, 12 }
  0x31   :  { %v456_v25 = vsel %vm1127_vm10, %v315_v23, %v397_v1  ;;  %v484_v34 = vcombine.low %v454_v22, %v455_v24  ;;  %v492_v37 = vrot.slane %v482_v29, %v804_v3  ;;  %v499_v38 = vrot.slane %v483_v30, %v804_v3 }
  0x32   :  { %v485_v27 = vcombine.low %v456_v25, %v457_v26  ;;  %vm1137_vm5 = vnez %v1108_v11  ;;  %vm915_vm0 = vcmp.ge.s32.totalorder %v128_v6, 4  ;;  %vm919_vm7 = vcmp.ge.s32.totalorder %v135_v7, 4 }
  0x33   :  { %v506_v39 = vrot.slane %v484_v34, %v804_v3  ;;  %vm923_vm14 = vcmp.lt.s32.totalorder %v128_v6, 12  ;;  %v514_v55 = vcombine.low %v492_v37, %v499_v38  ;;  %vm931_vm2 = vcmp.ge.s32.totalorder %v142_v9, 4  ;;  %vm1156_vm4 = vmand %vm1137_vm5, %vm831_vm15 }
  0x34   :  { %v513_v48 = vrot.slane %v485_v27, %v804_v3  ;;  %v1146_v57 = vmov 0  ;;  %vm935_vm10 = vcmp.lt.s32.totalorder %v135_v7, 12  ;;  %vm943_vm9 = vcmp.ge.s32.totalorder %v149_v10, 4  ;;  %vm1162_vm15 = vmand %vm915_vm0, %vm923_vm14 }
  0x35   :  { %v1147_v57 = vsel %vm931_vm2, 4294967295, %v1146_v57  ;;  %v1150_v59 = vmov 0  ;;  %vm947_vm8 = vcmp.lt.s32.totalorder %v142_v9, 12  ;;  %v1152_v60 = vmov 0  ;;  %vm1161_vm2 = vmand %vm895_vm12, %vm903_vm13 }
  0x36   :  { %v515_v56 = vcombine.low %v506_v39, %v513_v48  ;;  %v1151_v59 = vsel %vm943_vm9, 4294967295, %v1150_v59  ;;  %v1153_v60 = vsel %vm947_vm8, 4294967295, %v1152_v60  ;;  %vm951_vm1 = vcmp.lt.s32.totalorder %v149_v10, 12  ;;  %vm1160_vm8 = vmand %vm891_vm11, %vm899_vm6 }
  0x37   :  { %v1154_v62 = vmov 0  ;;  %v283_v63 = vadd.f32 1.0, %v605_v54  ;;  %v522_v0 = vrot.slane %v514_v55, %v804_v3  ;;  %v405_v2 = vrot.slane %v794_v61, %v718_v31  ;;  %vm1163_vm5 = vmand %vm919_vm7, %vm935_vm10 }
  0x38   :  { %v1155_v62 = vsel %vm951_vm1, 4294967295, %v1154_v62  ;;  %v529_v1 = vrot.slane %v515_v56, %v804_v3  ;;  %v409_v4 = vrot.slane %v794_v61, %v720_v32  ;;  %v413_v6 = vrot.slane %v794_v61, %v750_v40 }
  0x39   :  { %v285_v5 = vmul.f32 0.5, %v283_v63  ;;  %v417_v7 = vrot.slane %v794_v61, %v752_v41  ;;  %v421_v8 = vrot.slane %v794_v61, %v754_v42  ;;  %v425_v10 = vrot.slane %v794_v61, %v756_v43 }
  0x3a   :  { %v530_v9 = vcombine.low %v522_v0, %v529_v1  ;;  %v429_v15 = vrot.slane %v794_v61, %v758_v46  ;;  %v433_v16 = vrot.slane %v794_v61, %v760_v47  ;;  %vm1157_vm3 = vnez %v1110_v12 }
  0x3b   :  { %v323_v17 = vrot.slane %v285_v5, %v718_v31  ;;  %v327_v18 = vrot.slane %v285_v5, %v720_v32  ;;  %v331_v19 = vrot.slane %v285_v5, %v750_v40  ;;  %v335_v20 = vrot.slane %v285_v5, %v752_v41 }
  0x3c   :  { %582 = vst [vmem:[#allocation5] sm:$0xff] %v530_v9  ;;  %v339_v23 = vrot.slane %v285_v5, %v754_v42  ;;  %v343_v44 = vrot.slane %v285_v5, %v756_v43  ;;  %v347_v61 = vrot.slane %v285_v5, %v758_v46  ;;  %v351_v45 = vrot.slane %v285_v5, %v760_v47 }
  0x3d   :  { %v458_v31 = vsel %vm1156_vm4, %v323_v17, %v405_v2  ;;  %vm1158_vm1 = vnez %v1114_v14  ;;  %v460_v40 = vsel %vm1160_vm8, %v331_v19, %v413_v6  ;;  %v461_v41 = vsel %vm1161_vm2, %v335_v20, %v417_v7 }
  0x3e   :  { %vm1159_vm9 = vmand %vm1157_vm3, %vm1158_vm1  ;;  %v462_v42 = vsel %vm1162_vm15, %v339_v23, %v421_v8  ;;  %v463_v43 = vsel %vm1163_vm5, %v343_v44, %v425_v10  ;;  %vm1164_vm11 = vnez %v1147_v57  ;;  %vm1165_vm6 = vnez %v1153_v60 }
  0x3f   :  { %v459_v32 = vsel %vm1159_vm9, %v327_v18, %v409_v4  ;;  %vm1166_vm9 = vmand %vm1164_vm11, %vm1165_vm6  ;;  %vm1167_vm12 = vnez %v1151_v59  ;;  %vm1168_vm13 = vnez %v1155_v62  ;;  %v532_v12 = vcombine.low %v460_v40, %v461_v41 }
  0x40   :  { %v464_v46 = vsel %vm1166_vm9, %v347_v61, %v429_v15  ;;  %vm1169_vm1 = vmand %vm1167_vm12, %vm1168_vm13  ;;  %v531_v11 = vcombine.low %v458_v31, %v459_v32  ;;  %v533_v13 = vcombine.low %v462_v42, %v463_v43 }
  0x41   :  { %v465_v47 = vsel %vm1169_vm1, %v351_v45, %v433_v16  ;;  %v548_v51 = vrot.slane %v532_v12, %v804_v3 }
  0x42   :  { %v534_v14 = vcombine.low %v464_v46, %v465_v47  ;;  %v541_v50 = vrot.slane %v531_v11, %v804_v3  ;;  %v555_v21 = vrot.slane %v533_v13, %v804_v3 }
  0x44   :  { %v562_v22 = vrot.slane %v534_v14, %v804_v3  ;;  %v563_v24 = vcombine.low %v541_v50, %v548_v51 }
  0x46   :  { %v564_v25 = vcombine.low %v555_v21, %v562_v22  ;;  %v571_v26 = vrot.slane %v563_v24, %v804_v3 }
  0x48   :  { %v578_v29 = vrot.slane %v564_v25, %v804_v3 }
  0x4a   :  { %v579_v30 = vcombine.low %v571_v26, %v578_v29 }
  0x4c   :  { %583 = vst [vmem:[#allocation5 + $0x8] sm:$0xff] %v579_v30 }
  0x4d   :  { %639 = shalt.err (!%p636_p12)
}
  0x4e   :  { %s640_s22 = scalar_lea.hbm %s1060_s1, 256 }
  0x4f   :  { %p641_p13 = scmp.ne.s32.totalorder %s1060_s1, %s640_s22  ;;  %p644_p0 = scmp.lt.u32.totalorder %s640_s22, %s1060_s1 }
  0x51   :  { %p646_p1 = pnand %p644_p0, %p641_p13 }
  0x53   :  { %649 = shalt.err (!%p646_p1)
}
  0x54   :  { %593 = dma.vmem_to_hbm [thread:$0]  %s591_s18, 256, %s1060_s1, [#allocation4]  }
  0x55   :  { %652 = dma.done.wait [#allocation4], 256  }
  0x56   :  { %653 = vsyncadd [#allocation4], 4294967040 }
  0x57   :  { %597 = vsyncpa [#allocation3], 1 }
  0x58   :  { %598 = vsyncpa [#allocation4], 1 }

</bundles_post_ra>
